<compile_context>
chip_gen: v5e
topology: v5e:2x2
jax: 0.10.0
libtpu: 0.0.40
codegen_flags: <defaults>
</compile_context>

<pallas_src>
import functools
import math

import numpy as np
import jax
import jax.numpy as jnp
from jax import lax
from jax.experimental import pallas as pl
from jax.experimental.pallas import tpu as pltpu

LN_EPS = 1e-6


# ----------------------------------------------------------------------------
# Kernels
# ----------------------------------------------------------------------------
def _layernorm(v, g, b):
    mu = jnp.mean(v, axis=-1, keepdims=True)
    xc = v - mu
    var = jnp.mean(xc * xc, axis=-1, keepdims=True)
    return xc * lax.rsqrt(var + LN_EPS) * g + b


def patch_embed_kernel(p_ref, w_ref, b_ref, cls_ref, pos_ref, o_ref):
    """Patchify-matmul + bias, prepend cls token, add positional embedding (one image).

    p_ref:   (1, Np, K)   K = C*P*P flattened patches
    w_ref:   (K, D);  b_ref: (1, D);  cls_ref: (1, D);  pos_ref: (S, D)  with S = Np + 1
    o_ref:   (1, S, D)
    """
    tok = jnp.dot(p_ref[0], w_ref[...], preferred_element_type=jnp.float32) + b_ref[...]
    seq = jnp.concatenate([cls_ref[...], tok], axis=0) + pos_ref[...]
    o_ref[0] = seq.astype(o_ref.dtype)


def vit_block_kernel(x_ref, ln1_g, ln1_b, wqkv, bqkv, wproj, bproj,
                     ln2_g, ln2_b, wfc1, bfc1, wfc2, bfc2, o_ref, *, num_heads):
    """Fused ViT encoder block for one image.

    x_ref / o_ref: (1, S, D)
    wqkv: (D, 3D); wproj: (D, D); wfc1: (D, Dh); wfc2: (Dh, D); biases: (1, ...)
    """
    S, D = x_ref.shape[1], x_ref.shape[2]
    dh = D // num_heads
    scale = 1.0 / math.sqrt(dh)

    x = x_ref[0].astype(jnp.float32)                                     # (S, D)

    # ---- attention branch ----
    h = _layernorm(x, ln1_g[...], ln1_b[...])
    qkv = jnp.dot(h, wqkv[...], preferred_element_type=jnp.float32) + bqkv[...]   # (S, 3D)

    heads = []
    for i in range(num_heads):                                           # unrolled, small
        q = qkv[:, i * dh:(i + 1) * dh]
        k = qkv[:, D + i * dh:D + (i + 1) * dh]
        v = qkv[:, 2 * D + i * dh:2 * D + (i + 1) * dh]
        s = jnp.einsum('sd,td->st', q, k,
                       preferred_element_type=jnp.float32) * scale       # (S, S)
        s = s - jnp.max(s, axis=-1, keepdims=True)
        e = jnp.exp(s)
        p = e / jnp.sum(e, axis=-1, keepdims=True)
        heads.append(jnp.dot(p, v, preferred_element_type=jnp.float32))  # (S, dh)
    attn = jnp.concatenate(heads, axis=-1)                               # (S, D)

    y = x + jnp.dot(attn, wproj[...], preferred_element_type=jnp.float32) + bproj[...]

    # ---- MLP branch ----
    h2 = _layernorm(y, ln2_g[...], ln2_b[...])
    m = jax.nn.gelu(
        jnp.dot(h2, wfc1[...], preferred_element_type=jnp.float32) + bfc1[...],
        approximate=True)
    y2 = y + jnp.dot(m, wfc2[...], preferred_element_type=jnp.float32) + bfc2[...]

    o_ref[0] = y2.astype(o_ref.dtype)


def layernorm_kernel(x_ref, g_ref, b_ref, o_ref):
    """Final LayerNorm over flattened (B*S, D) tokens."""
    o_ref[...] = _layernorm(x_ref[...].astype(jnp.float32),
                            g_ref[...], b_ref[...]).astype(o_ref.dtype)


# ----------------------------------------------------------------------------
# Wrappers (pallas_call glue)
# ----------------------------------------------------------------------------
_VMEM_LIMIT = 48 * 1024 * 1024   # <= v7x physical VMEM (64 MiB), fine on v5e/v6e


def _full_spec(arr):
    shp = arr.shape
    return pl.BlockSpec(shp, lambda *_, _r=len(shp): (0,) * _r)


def extract_patches(x_nchw, patch):
    """(B, C, H, W) -> (B, Np, C*P*P), same patch ordering as timm's conv patch-embed."""
    B, C, H, W = x_nchw.shape
    hp, wp = H // patch, W // patch
    p = x_nchw.reshape(B, C, hp, patch, wp, patch)
    p = jnp.transpose(p, (0, 2, 4, 1, 3, 5))        # (B, hp, wp, C, P, P)
    return p.reshape(B, hp * wp, C * patch * patch)


def patch_embed(patches, w, b, cls, pos):
    B, Np, K = patches.shape
    S, D = pos.shape
    return pl.pallas_call(
        patch_embed_kernel,
        out_shape=jax.ShapeDtypeStruct((B, S, D), jnp.float32),
        grid=(B,),
        in_specs=[
            pl.BlockSpec((1, Np, K), lambda n: (n, 0, 0)),
            _full_spec(w), _full_spec(b), _full_spec(cls), _full_spec(pos),
        ],
        out_specs=pl.BlockSpec((1, S, D), lambda n: (n, 0, 0)),
        compiler_params=pltpu.CompilerParams(
            dimension_semantics=("parallel",),
            vmem_limit_bytes=_VMEM_LIMIT),
    )(patches, w, b, cls, pos)


BLOCK_KEYS = ('ln1_g', 'ln1_b', 'wqkv', 'bqkv', 'wproj', 'bproj',
              'ln2_g', 'ln2_b', 'wfc1', 'bfc1', 'wfc2', 'bfc2')


def vit_block(x, p, num_heads):
    B, S, D = x.shape
    ws = [p[k] for k in BLOCK_KEYS]
    return pl.pallas_call(
        functools.partial(vit_block_kernel, num_heads=num_heads),
        out_shape=jax.ShapeDtypeStruct((B, S, D), jnp.float32),
        grid=(B,),
        in_specs=[pl.BlockSpec((1, S, D), lambda n: (n, 0, 0))]
                 + [_full_spec(w) for w in ws],
        out_specs=pl.BlockSpec((1, S, D), lambda n: (n, 0, 0)),
        compiler_params=pltpu.CompilerParams(
            dimension_semantics=("parallel",),
            vmem_limit_bytes=_VMEM_LIMIT),
    )(x, *ws)


def final_layernorm(x, g, b):
    B, S, D = x.shape
    xf = x.reshape(B * S, D)
    y = pl.pallas_call(
        layernorm_kernel,
        out_shape=jax.ShapeDtypeStruct((B * S, D), jnp.float32),
        grid=(1,),
        in_specs=[pl.BlockSpec((B * S, D), lambda i: (0, 0)),
                  _full_spec(g), _full_spec(b)],
        out_specs=pl.BlockSpec((B * S, D), lambda i: (0, 0)),
        compiler_params=pltpu.CompilerParams(
            dimension_semantics=("arbitrary",),
            vmem_limit_bytes=_VMEM_LIMIT),
    )(xf, g, b)
    return y.reshape(B, S, D)


# ----------------------------------------------------------------------------
# Parameters (deterministic synthetic init with the ViT's shapes)
# ----------------------------------------------------------------------------
def init_vit_params(key, *, in_channels, img_size, patch_size, embed_dim,
                    depth, num_heads, mlp_ratio):
    P = patch_size
    K = in_channels * P * P
    Np = (img_size // P) ** 2
    S = Np + 1
    D = embed_dim
    Dh = int(D * mlp_ratio)
    assert D % num_heads == 0

    keys = jax.random.split(key, depth + 1)
    k0 = jax.random.split(keys[0], 6)

    def nrm(k, shape, std):
        return jax.random.normal(k, shape, jnp.float32) * std

    params = {
        'patch_w': nrm(k0[0], (K, D), (2.0 / K) ** 0.5),
        'patch_b': nrm(k0[1], (1, D), 0.02),
        'cls':     nrm(k0[2], (1, D), 0.02),
        'pos':     nrm(k0[3], (S, D), 0.02),
        'ln_g':    1.0 + 0.05 * jax.random.normal(k0[4], (1, D), jnp.float32),
        'ln_b':    0.05 * jax.random.normal(k0[5], (1, D), jnp.float32),
        'blocks':  [],
    }
    for i in range(depth):
        bk = jax.random.split(keys[i + 1], 12)
        params['blocks'].append({
            'ln1_g': 1.0 + 0.05 * jax.random.normal(bk[0], (1, D), jnp.float32),
            'ln1_b': 0.05 * jax.random.normal(bk[1], (1, D), jnp.float32),
            'wqkv':  nrm(bk[2], (D, 3 * D), D ** -0.5),
            'bqkv':  nrm(bk[3], (1, 3 * D), 0.02),
            'wproj': nrm(bk[4], (D, D), D ** -0.5),
            'bproj': nrm(bk[5], (1, D), 0.02),
            'ln2_g': 1.0 + 0.05 * jax.random.normal(bk[6], (1, D), jnp.float32),
            'ln2_b': 0.05 * jax.random.normal(bk[7], (1, D), jnp.float32),
            'wfc1':  nrm(bk[8], (D, Dh), D ** -0.5),
            'bfc1':  nrm(bk[9], (1, Dh), 0.02),
            'wfc2':  nrm(bk[10], (Dh, D), Dh ** -0.5),
            'bfc2':  nrm(bk[11], (1, D), 0.02),
        })
    return params


# ----------------------------------------------------------------------------
# ViTBlock forward (Pallas)
# ----------------------------------------------------------------------------
def vit_forward(x_nchw, params, *, img_size, patch_size, num_heads):
    B, C, H, W = x_nchw.shape
    # TODO(synk): F.interpolate(bilinear) resize for mismatched input sizes is not
    # implemented; inputs are generated at img_size so that branch is a no-op.
    assert H == img_size and W == img_size

    patches = extract_patches(x_nchw, patch_size)                 # layout glue only
    x = patch_embed(patches, params['patch_w'], params['patch_b'],
                    params['cls'], params['pos'])                 # (B, S, D)
    for blk in params['blocks']:
        x = vit_block(x, blk, num_heads)                          # fused encoder block
    x = final_layernorm(x, params['ln_g'], params['ln_b'])
    tok = x[:, 1:, :]                                             # drop cls token
    Hp = H // patch_size
    return jnp.transpose(tok, (0, 2, 1)).reshape(B, -1, Hp, Hp)   # (B, D, Hp, Wp)


# ----------------------------------------------------------------------------
# Pure-JAX reference (for the numerics check)
# ----------------------------------------------------------------------------
def reference_forward(x_nchw, params, *, img_size, patch_size, num_heads):
    def ln(v, g, b):
        mu = jnp.mean(v, axis=-1, keepdims=True)
        xc = v - mu
        var = jnp.mean(xc * xc, axis=-1, keepdims=True)
        return xc * lax.rsqrt(var + LN_EPS) * g + b

    def block(x, p):
        B, S, D = x.shape
        dh = D // num_heads
        h = ln(x, p['ln1_g'], p['ln1_b'])
        qkv = h @ p['wqkv'] + p['bqkv']
        q, k, v = qkv[..., :D], qkv[..., D:2 * D], qkv[..., 2 * D:]
        q = q.reshape(B, S, num_heads, dh).transpose(0, 2, 1, 3)
        k = k.reshape(B, S, num_heads, dh).transpose(0, 2, 1, 3)
        v = v.reshape(B, S, num_heads, dh).transpose(0, 2, 1, 3)
        s = jnp.einsum('bhsd,bhtd->bhst', q, k) * (dh ** -0.5)
        a = jax.nn.softmax(s, axis=-1)
        o = jnp.einsum('bhst,bhtd->bhsd', a, v).transpose(0, 2, 1, 3).reshape(B, S, D)
        x = x + o @ p['wproj'] + p['bproj']
        h2 = ln(x, p['ln2_g'], p['ln2_b'])
        m = jax.nn.gelu(h2 @ p['wfc1'] + p['bfc1'], approximate=True)
        return x + m @ p['wfc2'] + p['bfc2']

    with jax.default_matmul_precision('highest'):
        B, C, H, W = x_nchw.shape
        patches = extract_patches(x_nchw, patch_size)
        t = patches @ params['patch_w'] + params['patch_b']
        cls = jnp.broadcast_to(params['cls'][None], (B, 1, t.shape[-1]))
        x = jnp.concatenate([cls, t], axis=1) + params['pos'][None]
        for blk in params['blocks']:
            x = block(x, blk)
        x = ln(x, params['ln_g'], params['ln_b'])
        tok = x[:, 1:, :]
        Hp = H // patch_size
        return jnp.transpose(tok, (0, 2, 1)).reshape(B, -1, Hp, Hp)


# ----------------------------------------------------------------------------
if __name__ == "__main__":
    key = jax.random.PRNGKey(0)
    kx, kp = jax.random.split(key)

    # Small shapes consistent with the module: img 16, patch 4 -> 16 patches + cls = 17
    # tokens, embed_dim 128 (lane-dense), 4 heads, depth 2, mlp_ratio 4, 3 input channels.
    B, CIN, IMG, PATCH = 2, 3, 16, 4
    EMBED, DEPTH, HEADS, MLP_RATIO = 128, 2, 4, 4

    x = jax.random.normal(kx, (B, CIN, IMG, IMG), jnp.float32)    # PyTorch NCHW input
    params = init_vit_params(kp, in_channels=CIN, img_size=IMG, patch_size=PATCH,
                             embed_dim=EMBED, depth=DEPTH, num_heads=HEADS,
                             mlp_ratio=MLP_RATIO)

    out = vit_forward(x, params, img_size=IMG, patch_size=PATCH, num_heads=HEADS)
    out = jax.block_until_ready(out)

    ref = reference_forward(x, params, img_size=IMG, patch_size=PATCH, num_heads=HEADS)
    np.testing.assert_allclose(np.asarray(out), np.asarray(ref), rtol=5e-3, atol=5e-3)

    print("KERNEL_OK")
</pallas_src>

<mosaic_0001>
module attributes {stable_mosaic.version = 11 : i64} {
  func.func @patch_embed_kernel(%arg0: i32, %arg1: memref<1x16x48xf32, #tpu.memory_space<vmem>>, %arg2: memref<48x128xf32, #tpu.memory_space<vmem>>, %arg3: memref<1x128xf32, #tpu.memory_space<vmem>>, %arg4: memref<1x128xf32, #tpu.memory_space<vmem>>, %arg5: memref<17x128xf32, #tpu.memory_space<vmem>>, %arg6: memref<1x17x128xf32, #tpu.memory_space<vmem>>) attributes {dimension_semantics = [#tpu.dimension_semantics<parallel>], iteration_bounds = array<i64: 2>, scalar_prefetch = 0 : i64, scratch_operands = 0 : i64, tpu.core_type = #tpu.core_type<tc>, window_params = [{transform_indices = @transform_0, window_bounds = array<i64: 1, 16, 48>}, {pipeline_mode = #tpu.pipeline_mode<synchronous>, transform_indices = @transform_1, window_bounds = array<i64: 48, 128>}, {pipeline_mode = #tpu.pipeline_mode<synchronous>, transform_indices = @transform_2, window_bounds = array<i64: 1, 128>}, {pipeline_mode = #tpu.pipeline_mode<synchronous>, transform_indices = @transform_3, window_bounds = array<i64: 1, 128>}, {pipeline_mode = #tpu.pipeline_mode<synchronous>, transform_indices = @transform_4, window_bounds = array<i64: 17, 128>}, {transform_indices = @transform_5, window_bounds = array<i64: 1, 17, 128>}]} {
    %c0 = arith.constant 0 : index
    %c0_0 = arith.constant 0 : index
    %c0_1 = arith.constant 0 : index
    %0 = vector.load %arg1[%c0, %c0_0, %c0_1] : memref<1x16x48xf32, #tpu.memory_space<vmem>>, vector<1x16x48xf32>
    %1 = vector.shape_cast %0 : vector<1x16x48xf32> to vector<16x48xf32>
    %c0_2 = arith.constant 0 : index
    %c0_3 = arith.constant 0 : index
    %2 = vector.load %arg2[%c0_2, %c0_3] : memref<48x128xf32, #tpu.memory_space<vmem>>, vector<48x128xf32>
    %cst = arith.constant dense<0.000000e+00> : vector<16x128xf32>
    %3 = tpu.matmul %1, %2, %cst {dimension_numbers = #tpu.dot_dimension_numbers<[1], [0], [0], [1], [0, 0, 1, 1], [], []>} : vector<16x48xf32>, vector<48x128xf32>, vector<16x128xf32> -> vector<16x128xf32>
    %c0_4 = arith.constant 0 : index
    %c0_5 = arith.constant 0 : index
    %4 = vector.load %arg3[%c0_4, %c0_5] : memref<1x128xf32, #tpu.memory_space<vmem>>, vector<1x128xf32>
    %5 = vector.broadcast %4 : vector<1x128xf32> to vector<16x128xf32>
    %6 = arith.addf %3, %5 : vector<16x128xf32>
    %c0_6 = arith.constant 0 : index
    %c0_7 = arith.constant 0 : index
    %7 = vector.load %arg4[%c0_6, %c0_7] : memref<1x128xf32, #tpu.memory_space<vmem>>, vector<1x128xf32>
    %8 = tpu.concatenate %7, %6 in 0 : vector<1x128xf32>, vector<16x128xf32> -> vector<17x128xf32>
    %c0_8 = arith.constant 0 : index
    %c0_9 = arith.constant 0 : index
    %9 = vector.load %arg5[%c0_8, %c0_9] : memref<17x128xf32, #tpu.memory_space<vmem>>, vector<17x128xf32>
    %10 = arith.addf %8, %9 : vector<17x128xf32>
    %c0_10 = arith.constant 0 : index
    %c0_11 = arith.constant 0 : index
    %c0_12 = arith.constant 0 : index
    %11 = vector.load %arg6[%c0_10, %c0_11, %c0_12] : memref<1x17x128xf32, #tpu.memory_space<vmem>>, vector<1x17x128xf32>
    %12 = vector.shape_cast %11 : vector<1x17x128xf32> to vector<17x128xf32>
    %13 = vector.shape_cast %10 : vector<17x128xf32> to vector<1x17x128xf32>
    tpu.vector_store %arg6[%c0_10, %c0_11, %c0_12], %13 {strides = array<i32>} : memref<1x17x128xf32, #tpu.memory_space<vmem>>, vector<1x17x128xf32>,
    return
  }
  func.func @transform_0(%arg0: i32) -> (i32, i32, i32) {
    %c0_i32 = arith.constant 0 : i32
    %c0_i32_0 = arith.constant 0 : i32
    %c0_i32_1 = arith.constant 0 : i32
    return %arg0, %c0_i32, %c0_i32_0 : i32, i32, i32
  }
  func.func @transform_1(%arg0: i32) -> (i32, i32) {
    %c0_i32 = arith.constant 0 : i32
    %c0_i32_0 = arith.constant 0 : i32
    %c0_i32_1 = arith.constant 0 : i32
    return %c0_i32, %c0_i32_0 : i32, i32
  }
  func.func @transform_2(%arg0: i32) -> (i32, i32) {
    %c0_i32 = arith.constant 0 : i32
    %c0_i32_0 = arith.constant 0 : i32
    %c0_i32_1 = arith.constant 0 : i32
    return %c0_i32, %c0_i32_0 : i32, i32
  }
  func.func @transform_3(%arg0: i32) -> (i32, i32) {
    %c0_i32 = arith.constant 0 : i32
    %c0_i32_0 = arith.constant 0 : i32
    %c0_i32_1 = arith.constant 0 : i32
    return %c0_i32, %c0_i32_0 : i32, i32
  }
  func.func @transform_4(%arg0: i32) -> (i32, i32) {
    %c0_i32 = arith.constant 0 : i32
    %c0_i32_0 = arith.constant 0 : i32
    %c0_i32_1 = arith.constant 0 : i32
    return %c0_i32, %c0_i32_0 : i32, i32
  }
  func.func @transform_5(%arg0: i32) -> (i32, i32, i32) {
    %c0_i32 = arith.constant 0 : i32
    %c0_i32_0 = arith.constant 0 : i32
    %c0_i32_1 = arith.constant 0 : i32
    return %arg0, %c0_i32, %c0_i32_0 : i32, i32, i32
  }
}

</mosaic_0001>

<bundles_post_ra>
// kernel: tpu_custom_call.1
= control target key start
LH: loop header
LB: loop body
LE: loop exit
PB: predicated region body
PF: predicated region fallthrough
CT: control target
= control target key end

     0   :  { %10 = vsyncpa [#allocation3], 0  ;;  %s801_s0 = inlined_call_operand.hbm [shape: f32[2,16,48], index: 0, kind: input, shape index: {}]   ;;  %s802_s1 = inlined_call_operand.hbm [shape: f32[48,128], index: 1, kind: input, shape index: {}]   ;;  %s803_s2 = inlined_call_operand.vmem [shape: f32[1,128], index: 2, kind: input, shape index: {}]   ;;  %s804_s3 = inlined_call_operand.vmem [shape: f32[1,128], index: 3, kind: input, shape index: {}]   ;;  %s805_s4 = inlined_call_operand.hbm [shape: f32[17,128], index: 4, kind: input, shape index: {}]   ;;  %s806_s5 = inlined_call_operand.vmem [shape: f32[2,17,128], index: 5, kind: output, shape index: {}]  }
   0x1   :  { %12 = vsyncpa [#allocation3 + $0x1], 0 }
   0x2   :  { %13 = vsyncpa [#allocation5], 0  ;;  %s680_s18 = smov 0   ;;  %s682_s19 = smov 0  }
   0x3   :  { %s684_s20 = smov 0   ;;  %s686_s21 = smov 0  }
   0x4 LB: > { %s699_s22 = sadd.s32 4294967295, %s644_s21   ;;  %p39_p0 = scmp.ne.s32.totalorder %s636_s19, %s632_s18  ;;  %s644_s21 = sphi %s686_s21, %s813_s21   ;;  %s640_s20 = sphi %s684_s20, %s812_s20   ;;  %s636_s19 = sphi %s682_s19, %s811_s19   ;;  %s632_s18 = sphi %s680_s18, %s810_s18  }
   0x5   : > { %p40_p1 = scmp.eq.s32.totalorder %s699_s22, 0  ;;  %p429_p2 = scmp.ge.s32.totalorder %s644_s21, 1 }
   0x6   : > { %p160_p3 = scmp.lt.s32.totalorder %s644_s21, 3  ;;  %s171_s26 = sshll.u32 %s802_s1, 4  ;;  %s172_s26 = int_to_ptr.hbm [resolvable:$true] %s171_s26 }
   0x7   : > { %p707_p4 = por %p40_p1, %p39_p0  ;;  %s646_s28 = smov [#allocation4]  }
   0x8   : > { %p714_p5 = pnand %p429_p2, %p160_p3  ;;  %s173_s29 = sshll.u32 %s646_s28, 4  ;;  %s174_s29 = int_to_ptr.vmem [resolvable:$true] %s173_s29 }
   0x9   : > { %s191_s7 = sshll.u32 %s805_s4, 4  ;;  %s647_s8 = smov 128   ;;  %s192_s7 = int_to_ptr.hbm [resolvable:$true] %s191_s7 }
   0xa   : > { %p463_p6 = pneg %p714_p5  ;;  %s648_s9 = smov 8  }
   0xb   : > { %s649_s10 = smov [#allocation6]   ;;  %s732_s12 = sadd.s32 1, %s644_s21  }
   0xc   : > { %p464_p7 = pnand %p463_p6, %p40_p1  ;;  %s193_s11 = sshll.u32 %s649_s10, 4  ;;  %s194_s11 = int_to_ptr.vmem [resolvable:$true] %s193_s11 }
   0xd   : > { %s26_s13 = sadd.s32 1, %s640_s20  ;;  %s23_s14 = ssub.s32 %s644_s21, %s732_s12 }
   0xe   : > { %466 = dma.hbm_to_vmem [thread:$0]  (!%p464_p7), %s172_s26, 768, %s174_s29, [#allocation5], %s647_s8, %s647_s8, %s648_s9  }
   0xf   : > { %469 = dma.hbm_to_vmem [thread:$0]  (!%p464_p7), %s192_s7, 384, %s194_s11, [#allocation5], %s647_s8, %s647_s8, %s648_s9  }
  0x10   : > { %p33_p8 = scmp.ne.s32.totalorder %s640_s20, %s636_s19  ;;  %p24_p9 = scmp.eq.s32.totalorder %s23_s14, 0 }
  0x11   : > { %p34_p10 = scmp.eq.s32.totalorder %s644_s21, 0  ;;  %s207_s15 = sand.u32 1, %s640_s20  }
  0x12   : > { %s742_s16 = scalar_select %p24_p9, %s640_s20, %s26_s13  }
  0x13   : > { %p35_p11 = por %p34_p10, %p33_p8  ;;  %p476_p12 = scmp.lt.s32.totalorder %s644_s21, 2 }
  0x14   : > { %s433_s17 = sshll.u32 %s207_s15, 4  ;;  %s445_s18 = sshll.u32 %s644_s21, 4 }
  0x15   : > { %s216_s26 = scalar_lea.hbm %s801_s0, %s445_s18  ;;  %s211_s29 = scalar_lea.vmem [#allocation2], %s433_s17 }
  0x16   : > { %s217_s28 = sshll.u32 %s216_s26, 4  ;;  %s219_s30 = sshll.u32 %s211_s29, 4  ;;  %s218_s28 = int_to_ptr.hbm [resolvable:$true] %s217_s28  ;;  %s220_s30 = int_to_ptr.vmem [resolvable:$true] %s219_s30 }
  0x17   : > { %p749_p13 = pnand %p476_p12, %p35_p11  ;;  %s208_s7 = scalar_lea.sflag [#allocation3], %s207_s15 }
  0x18   : > { %s576_s10 = sshra.s32 %s218_s28, 4  ;;  %s583_s14 = scalar_lea.hbm %s801_s0, 32  ;;  %s577_s10 = int_to_ptr.hbm [resolvable:$true] %s576_s10 }
  0x19   : > { %s578_s11 = scalar_lea.hbm %s577_s10, 16  ;;  %p580_p2 = pneg %p749_p13 }
  0x1a   : > { %p579_p0 = scmp.ne.s32.totalorder %s577_s10, %s578_s11  ;;  %p584_p7 = scmp.lt.s32.totalorder %s577_s10, %s801_s0 }
  0x1b   : > { %p585_p8 = scmp.lt.s32.totalorder %s583_s14, %s578_s11 }
  0x1c   : > { %p581_p3 = pnand %p580_p2, %p579_p0 }
  0x1d   : > { %p586_p9 = por %p585_p8, %p584_p7 }
  0x1e   : > { %p582_p6 = pneg %p581_p3 }
  0x20   : > { %p587_p10 = pnand %p586_p9, %p582_p6 }
  0x22   : > { %590 = shalt.err (!%p587_p10)
}
  0x23   : > { %473 = dma.hbm_to_vmem [thread:$0]  (!%p749_p13), %s218_s28, 256, %s220_s30, %s208_s7, %s647_s8, %s647_s8, %s648_s9  }
  0x24   : > { %231 = sbr.rel (%p714_p5) target bundleno = 191 (0xbf), region = 40  ;;  %s233_s15 = sand.u32 (!%p714_p5), 1, %s636_s19  }
  0x25   : > { %s437_s24 = sshll.u32 (!%p714_p5), %s233_s15, 4  ;;  %s234_s25 = scalar_lea.sflag (!%p714_p5), [#allocation3], %s233_s15 }
  0x26   : > { %s237_s26 = scalar_lea.vmem (!%p714_p5), [#allocation2], %s437_s24 }
  0x29   : > { %623 = dma.done.wait (%p707_p4), %s234_s25, 256  }
  0x2a   : > { %625 = vsyncadd (%p707_p4), %s234_s25, 4294967040 }
  0x2b   : > { %627 = dma.done.wait (%p40_p1), [#allocation5], 1152  }
  0x2c   : > { %629 = vsyncadd (%p40_p1), [#allocation5], 4294966144  ;;  %v287_v0 = vld [vmem:[#allocation4 + $0x28] sm:$0xff]  ;;  %v286_v1 = vld [vmem:[#allocation4 + $0x20] sm:$0xff]  ;;  %vm292_vm0 = vcmask 392192   ;;  %p275_p1 = scmp.lt.s32.totalorder %s699_s22, 1 }
  0x2d   : > { %309 = vmatpush.msra.mxu0 %v287_v0  ;;  %446 = vmatpush.msra.mxu1 %v287_v0  ;;  %v285_v2 = vld [vmem:[#allocation4 + $0x18] sm:$0xff]  ;;  %v284_v3 = vld [vmem:[#allocation4 + $0x10] sm:$0xff]  ;;  %v283_v4 = vld [vmem:[#allocation4 + $0x8] sm:$0xff]  ;;  %vm325_vm1 = vcmask 1040384  }
  0x2e   : > { %v282_v5 = vld [vmem:[#allocation4] sm:$0xff]  ;;  %v281_v7 = vld [vmem:[%s237_s26 + $0x8] sm:$0xff]  ;;  %s815_s22 = smov (!%p275_p1, %s699_s22), 1  ;;  %v333_v16 = vld [vmem:[#allocation6] sm:$0xff] }
  0x2f   : > { %310 = vmatpush.msra.mxu0 %v286_v1  ;;  %447 = vmatpush.msra.mxu1 %v286_v1  ;;  %v280_v6 = vld [vmem:[%s237_s26] sm:$0xff]  ;;  %s452_s8 = smul.u32 24, %s815_s22  ;;  %v334_v18 = vld [vmem:[#allocation6 + $0x8] sm:$0xff] }
  0x30   : > { %v515_v8 = vld [vmem:[%s803_s2] ss:$0 sm:$0xff] }
  0x31   : > { %311 = vmatpush.msra.mxu0 %v285_v2  ;;  %448 = vmatpush.msra.mxu1 %v285_v2  ;;  %v322_v13 = vld [vmem:[%s804_s3] sm:$0x1]  ;;  %s279_s6 = scalar_lea.vmem %s806_s5, %s452_s8 }
  0x32   : > { %v335_v14 = vld [vmem:[#allocation6 + $0x10] sm:$0x1] }
  0x33   : > { %312 = vmatpush.msra.mxu0 %v284_v3  ;;  %449 = vmatpush.msra.mxu1 %v284_v3 }
  0x35   : > { %313 = vmatpush.msra.mxu0 %v283_v4  ;;  %450 = vmatpush.msra.mxu1 %v283_v4 }
  0x37   : > { %314 = vmatpush.msra.mxu0 %v282_v5  ;;  %451 = vmatpush.msra.mxu1 %v282_v5 }
  0x38   : > { %441 = vmatmul.msk.f32.vlgmr.msra.gmra.mxu0 %vm292_vm0, %v280_v6  ;;  %442 = vmatmul.msk.f32.vlgmr.msra.gmra.mxu1 %vm292_vm0, %v281_v7 }
  0xb5   : > { %v316_v9 = vpop.f32.mrf.mxu0  ;;  %v319_v10 = vpop.f32.mrf.mxu1 }
  0xb6   : > { %v317_v11 = vadd.f32 %v515_v8, %v316_v9  ;;  %v320_v12 = vadd.f32 %v515_v8, %v319_v10 }
  0xb8   : > { %v326_v15 = vrot.slane %v317_v11, 7  ;;  %v327_v17 = vrot.slane %v320_v12, 7 }
  0xba   : > { %v332_v19 = vsel %vm325_vm1, %v322_v13, %v326_v15  ;;  %v328_v20 = vsel %vm325_vm1, %v326_v15, %v327_v17  ;;  %v338_v21 = vadd.f32 %v335_v14, %v327_v17 }
  0xbb   : > { %v336_v22 = vadd.f32 %v333_v16, %v332_v19  ;;  %v337_v23 = vadd.f32 %v334_v18, %v328_v20 }
  0xbc   : > { %341 = vst [vmem:[%s279_s6 + $0x10] sm:$0x1] %v338_v21 }
  0xbd   : > { %339 = vst [vmem:[%s279_s6] sm:$0xff] %v336_v22 }
  0xbe   : > { %340 = vst [vmem:[%s279_s6 + $0x8] sm:$0xff] %v337_v23 }
  0xbf PF: > { %p16_p4 = scmp.ge.s32.totalorder %s732_s12, 4   ;;  %s810_s18 = smov %s636_s19 }
  0xc0   : > { %s811_s19 = smov %s640_s20  ;;  %s812_s20 = smov %s742_s16 }
  0xc1   : > { %s813_s21 = smov %s732_s12  ;;  %18 = sbr.rel (!%p16_p4) target bundleno = 4 (0x4), region = 88 }
  0xc6   :  { %363 = vsyncpa [#allocation3], 1 }
  0xc7   :  { %365 = vsyncpa [#allocation3 + $0x1], 1 }
  0xc8   :  { %366 = vsyncpa [#allocation5], 1 }

</bundles_post_ra>
